<compile_context>
chip_gen: v7x
topology: tpu7x:2x2x1
jax: 0.10.0
libtpu: 0.0.40
codegen_flags: <defaults>
</compile_context>

<pallas_src>
import jax
import jax.numpy as jnp
from jax.experimental import pallas as pl
from jax.experimental.pallas import tpu as pltpu

LANE = 128      # lane width: resident hidden dims are padded to multiples of this
BTILE = 16      # batch-tile granule (bf16 sublane packing = 16 rows per vreg)


def _round_up(n, m):
    return ((n + m - 1) // m) * m


def _pad_to(a, shape):
    return jnp.pad(a, [(0, s - d) for d, s in zip(a.shape, shape)])


def mlp_kernel(x_ref, w1_ref, w2_ref, w3_ref, b1_ref, b2_ref, b3_ref, o_ref):
    # Layer 1: Linear + ReLU.  x is bf16 with its true (9-wide) last dim; the
    # MXU contraction pads internally, HBM traffic stays at the real payload.
    h = jnp.dot(x_ref[...], w1_ref[...], preferred_element_type=jnp.float32)
    h = jnp.maximum(h + b1_ref[...], 0.0)
    # Layer 2: Linear + ReLU (cast activations back to bf16 for the MXU).
    h = jnp.dot(h.astype(w2_ref.dtype), w2_ref[...],
                preferred_element_type=jnp.float32)
    h = jnp.maximum(h + b2_ref[...], 0.0)
    # Layer 3: Linear (logits, no activation), emitted at true output width.
    o = jnp.dot(h.astype(w3_ref.dtype), w3_ref[...],
                preferred_element_type=jnp.float32)
    o_ref[...] = (o + b3_ref[...]).astype(o_ref.dtype)


def pack_params(w1, b1, w2, b2, w3, b3, *, dtype=jnp.bfloat16):
    """One-time padding/packing of the weights (hoisted out of the forward path).

    Weights come in as [in, out]; hidden dims are zero-padded to multiples of
    128 lanes (padded input cols hit zero weight rows, padded hidden units get
    bias 0 and ReLU(0)=0, so the math is unchanged).  The input and output
    feature dims keep their true widths.
    """
    x_dim, h1 = w1.shape
    h2 = w2.shape[1]
    y_dim = w3.shape[1]
    d1 = _round_up(h1, LANE)
    d2 = _round_up(h2, LANE)

    w1p = _pad_to(w1, (x_dim, d1)).astype(dtype)
    w2p = _pad_to(w2, (d1, d2)).astype(dtype)
    w3p = _pad_to(w3, (d2, y_dim)).astype(dtype)
    b1p = _pad_to(b1.reshape(1, -1), (1, d1)).astype(jnp.float32)
    b2p = _pad_to(b2.reshape(1, -1), (1, d2)).astype(jnp.float32)
    b3p = b3.reshape(1, -1).astype(jnp.float32)
    return (w1p, b1p, w2p, b2p, w3p, b3p)


def mlp_forward(x, packed_params, *, tile_b=1024):
    """x: [B, x_dim] f32 (or bf16). packed_params: output of pack_params()."""
    w1p, b1p, w2p, b2p, w3p, b3p = packed_params
    batch, x_dim = x.shape
    assert w1p.shape[0] == x_dim
    d1 = w1p.shape[1]
    d2 = w2p.shape[1]
    y_dim = w3p.shape[1]

    # Batch tile: multiple of 16, as large as the batch allows (per-grid-step
    # overhead is ~0.35 us), but capped at ceil(batch/2) so the grid has >= 2
    # tiles and both v7x TensorCores get work when the batch is big enough.
    tb = max(BTILE, _round_up(min(tile_b, batch), BTILE))
    if batch > BTILE:
        tb = min(tb, _round_up(-(-batch // 2), BTILE))
    pb = _round_up(batch, tb)

    # Only the batch dim is padded (to fill the last tile); the feature dim is
    # streamed at its true width, so HBM traffic matches the real payload.
    xp = x.astype(jnp.bfloat16)
    if pb != batch:
        xp = jnp.pad(xp, ((0, pb - batch), (0, 0)))

    grid = (pb // tb,)

    out = pl.pallas_call(
        mlp_kernel,
        out_shape=jax.ShapeDtypeStruct((pb, y_dim), jnp.float32),
        grid=grid,
        in_specs=[
            # x: streamed / double-buffered over the batch grid, true last dim.
            # (On bandwidth-poor v5e, add pipeline_mode=pl.Buffered(3) here if
            #  traces show exposed input DMA.)
            pl.BlockSpec((tb, x_dim), lambda i: (i, 0)),
            # weights + biases: constant index_map -> DMA'd once, VMEM-resident.
            pl.BlockSpec((x_dim, d1), lambda i: (0, 0)),
            pl.BlockSpec((d1, d2), lambda i: (0, 0)),
            pl.BlockSpec((d2, y_dim), lambda i: (0, 0)),
            pl.BlockSpec((1, d1), lambda i: (0, 0)),
            pl.BlockSpec((1, d2), lambda i: (0, 0)),
            pl.BlockSpec((1, y_dim), lambda i: (0, 0)),
        ],
        out_specs=pl.BlockSpec((tb, y_dim), lambda i: (i, 0)),
        compiler_params=pltpu.CompilerParams(
            dimension_semantics=("parallel",),      # shard batch tiles across TCs (v7x)
            vmem_limit_bytes=32 * 1024 * 1024,      # safe on v5e/v6e/v7x; usage is tiny
        ),
    )(xp, w1p, w2p, w3p, b1p, b2p, b3p)

    # Only batch padding (if any) needs slicing; no lane padding is ever written.
    return out[:batch] if pb != batch else out


def init_params(key, x_dim, h1, h2, y_dim):
    """Deterministic init mimicking nn.Linear (uniform(-1/sqrt(fan_in), 1/sqrt(fan_in)))."""
    ks = jax.random.split(key, 6)

    def linear(kw, kb, fan_in, fan_out):
        bound = 1.0 / jnp.sqrt(fan_in)
        # stored directly as [in, out] (i.e. the transpose of PyTorch's [out, in])
        w = jax.random.uniform(kw, (fan_in, fan_out), jnp.float32, -bound, bound)
        b = jax.random.uniform(kb, (1, fan_out), jnp.float32, -bound, bound)
        return w, b

    w1, b1 = linear(ks[0], ks[1], x_dim, h1)
    w2, b2 = linear(ks[2], ks[3], h1, h2)
    w3, b3 = linear(ks[4], ks[5], h2, y_dim)
    return w1, b1, w2, b2, w3, b3


def _reference_f32(x, w1, b1, w2, b2, w3, b3):
    h = jnp.maximum(x @ w1 + b1, 0.0)
    h = jnp.maximum(h @ w2 + b2, 0.0)
    return h @ w3 + b3


def _reference_bf16(x, w1, b1, w2, b2, w3, b3):
    """Same mixed precision as the kernel: bf16 operands, f32 accumulation."""
    bf = jnp.bfloat16
    h = jnp.dot(x.astype(bf), w1.astype(bf), preferred_element_type=jnp.float32) + b1
    h = jnp.maximum(h, 0.0)
    h = jnp.dot(h.astype(bf), w2.astype(bf), preferred_element_type=jnp.float32) + b2
    h = jnp.maximum(h, 0.0)
    return jnp.dot(h.astype(bf), w3.astype(bf), preferred_element_type=jnp.float32) + b3


if __name__ == "__main__":
    # Tic-tac-toe sized MLP: 9 board cells in, 9 move logits out.
    batch, x_dim, h1, h2, y_dim = 8, 9, 32, 32, 9

    key = jax.random.PRNGKey(0)
    k_x, k_p, k_x2 = jax.random.split(key, 3)
    x = jax.random.normal(k_x, (batch, x_dim), dtype=jnp.float32)
    params = init_params(k_p, x_dim, h1, h2, y_dim)

    # Pad/pack the weights once (hoisted out of the per-call forward path).
    packed = pack_params(*params)
    packed = tuple(jax.block_until_ready(p) for p in packed)

    out = jax.block_until_ready(mlp_forward(x, packed))
    assert out.shape == (batch, y_dim)
    # Tight check against a matched-precision (bf16 operands, f32 acc) reference.
    assert jnp.allclose(out, _reference_bf16(x, *params), atol=1e-3, rtol=1e-3)
    # Loose check against the pure-f32 reference (bf16 cast costs ~0.5% rel err).
    assert jnp.allclose(out, _reference_f32(x, *params), atol=5e-2, rtol=5e-2)

    # Extra check: batch not a multiple of the tile (exercises batch tail padding
    # and the >=2-tile grid path).
    x2 = jax.random.normal(k_x2, (13, x_dim), dtype=jnp.float32)
    out2 = jax.block_until_ready(mlp_forward(x2, packed))
    assert out2.shape == (13, y_dim)
    assert jnp.allclose(out2, _reference_bf16(x2, *params), atol=1e-3, rtol=1e-3)
    assert jnp.allclose(out2, _reference_f32(x2, *params), atol=5e-2, rtol=5e-2)

    print("KERNEL_OK")
</pallas_src>

<mosaic_0001>
module attributes {stable_mosaic.version = 11 : i64} {
  func.func @mlp_kernel(%arg0: i32, %arg1: memref<16x9xbf16, #tpu.memory_space<vmem>>, %arg2: memref<9x128xbf16, #tpu.memory_space<vmem>>, %arg3: memref<128x128xbf16, #tpu.memory_space<vmem>>, %arg4: memref<128x9xbf16, #tpu.memory_space<vmem>>, %arg5: memref<1x128xf32, #tpu.memory_space<vmem>>, %arg6: memref<1x128xf32, #tpu.memory_space<vmem>>, %arg7: memref<1x9xf32, #tpu.memory_space<vmem>>, %arg8: memref<16x9xf32, #tpu.memory_space<vmem>>) attributes {dimension_semantics = [#tpu.dimension_semantics<parallel>], iteration_bounds = array<i64: 1>, scalar_prefetch = 0 : i64, scratch_operands = 0 : i64, tpu.core_type = #tpu.core_type<tc>, window_params = [{transform_indices = @transform_0, window_bounds = array<i64: 16, 9>}, {pipeline_mode = #tpu.pipeline_mode<synchronous>, transform_indices = @transform_1, window_bounds = array<i64: 9, 128>}, {pipeline_mode = #tpu.pipeline_mode<synchronous>, transform_indices = @transform_2, window_bounds = array<i64: 128, 128>}, {pipeline_mode = #tpu.pipeline_mode<synchronous>, transform_indices = @transform_3, window_bounds = array<i64: 128, 9>}, {pipeline_mode = #tpu.pipeline_mode<synchronous>, transform_indices = @transform_4, window_bounds = array<i64: 1, 128>}, {pipeline_mode = #tpu.pipeline_mode<synchronous>, transform_indices = @transform_5, window_bounds = array<i64: 1, 128>}, {pipeline_mode = #tpu.pipeline_mode<synchronous>, transform_indices = @transform_6, window_bounds = array<i64: 1, 9>}, {transform_indices = @transform_7, window_bounds = array<i64: 16, 9>}]} {
    %c0 = arith.constant 0 : index
    %c0_0 = arith.constant 0 : index
    %0 = vector.load %arg1[%c0, %c0_0] : memref<16x9xbf16, #tpu.memory_space<vmem>>, vector<16x9xbf16>
    %c0_1 = arith.constant 0 : index
    %c0_2 = arith.constant 0 : index
    %1 = vector.load %arg2[%c0_1, %c0_2] : memref<9x128xbf16, #tpu.memory_space<vmem>>, vector<9x128xbf16>
    %cst = arith.constant dense<0.000000e+00> : vector<16x128xf32>
    %2 = tpu.matmul %0, %1, %cst {dimension_numbers = #tpu.dot_dimension_numbers<[1], [0], [0], [1], [0, 0, 1, 1], [], []>} : vector<16x9xbf16>, vector<9x128xbf16>, vector<16x128xf32> -> vector<16x128xf32>
    %c0_3 = arith.constant 0 : index
    %c0_4 = arith.constant 0 : index
    %3 = vector.load %arg5[%c0_3, %c0_4] : memref<1x128xf32, #tpu.memory_space<vmem>>, vector<1x128xf32>
    %4 = vector.broadcast %3 : vector<1x128xf32> to vector<16x128xf32>
    %5 = arith.addf %2, %4 : vector<16x128xf32>
    %cst_5 = arith.constant 0.000000e+00 : f32
    %6 = vector.broadcast %cst_5 : f32 to vector<16x128xf32>
    %7 = arith.maximumf %5, %6 : vector<16x128xf32>
    %8 = arith.truncf %7 : vector<16x128xf32> to vector<16x128xbf16>
    %c0_6 = arith.constant 0 : index
    %c0_7 = arith.constant 0 : index
    %9 = vector.load %arg3[%c0_6, %c0_7] : memref<128x128xbf16, #tpu.memory_space<vmem>>, vector<128x128xbf16>
    %cst_8 = arith.constant dense<0.000000e+00> : vector<16x128xf32>
    %10 = tpu.matmul %8, %9, %cst_8 {dimension_numbers = #tpu.dot_dimension_numbers<[1], [0], [0], [1], [0, 0, 1, 1], [], []>} : vector<16x128xbf16>, vector<128x128xbf16>, vector<16x128xf32> -> vector<16x128xf32>
    %c0_9 = arith.constant 0 : index
    %c0_10 = arith.constant 0 : index
    %11 = vector.load %arg6[%c0_9, %c0_10] : memref<1x128xf32, #tpu.memory_space<vmem>>, vector<1x128xf32>
    %12 = vector.broadcast %11 : vector<1x128xf32> to vector<16x128xf32>
    %13 = arith.addf %10, %12 : vector<16x128xf32>
    %cst_11 = arith.constant 0.000000e+00 : f32
    %14 = vector.broadcast %cst_11 : f32 to vector<16x128xf32>
    %15 = arith.maximumf %13, %14 : vector<16x128xf32>
    %16 = arith.truncf %15 : vector<16x128xf32> to vector<16x128xbf16>
    %c0_12 = arith.constant 0 : index
    %c0_13 = arith.constant 0 : index
    %17 = vector.load %arg4[%c0_12, %c0_13] : memref<128x9xbf16, #tpu.memory_space<vmem>>, vector<128x9xbf16>
    %cst_14 = arith.constant dense<0.000000e+00> : vector<16x9xf32>
    %18 = tpu.matmul %16, %17, %cst_14 {dimension_numbers = #tpu.dot_dimension_numbers<[1], [0], [0], [1], [0, 0, 1, 1], [], []>} : vector<16x128xbf16>, vector<128x9xbf16>, vector<16x9xf32> -> vector<16x9xf32>
    %c0_15 = arith.constant 0 : index
    %c0_16 = arith.constant 0 : index
    %19 = vector.load %arg7[%c0_15, %c0_16] : memref<1x9xf32, #tpu.memory_space<vmem>>, vector<1x9xf32>
    %20 = vector.broadcast %19 : vector<1x9xf32> to vector<16x9xf32>
    %21 = arith.addf %18, %20 : vector<16x9xf32>
    %c0_17 = arith.constant 0 : index
    %c0_18 = arith.constant 0 : index
    %22 = vector.load %arg8[%c0_17, %c0_18] : memref<16x9xf32, #tpu.memory_space<vmem>>, vector<16x9xf32>
    tpu.vector_store %arg8[%c0_17, %c0_18], %21 {strides = array<i32>} : memref<16x9xf32, #tpu.memory_space<vmem>>, vector<16x9xf32>,
    return
  }
  func.func @transform_0(%arg0: i32) -> (i32, i32) {
    %c0_i32 = arith.constant 0 : i32
    %c0_i32_0 = arith.constant 0 : i32
    return %arg0, %c0_i32 : i32, i32
  }
  func.func @transform_1(%arg0: i32) -> (i32, i32) {
    %c0_i32 = arith.constant 0 : i32
    %c0_i32_0 = arith.constant 0 : i32
    %c0_i32_1 = arith.constant 0 : i32
    return %c0_i32, %c0_i32_0 : i32, i32
  }
  func.func @transform_2(%arg0: i32) -> (i32, i32) {
    %c0_i32 = arith.constant 0 : i32
    %c0_i32_0 = arith.constant 0 : i32
    %c0_i32_1 = arith.constant 0 : i32
    return %c0_i32, %c0_i32_0 : i32, i32
  }
  func.func @transform_3(%arg0: i32) -> (i32, i32) {
    %c0_i32 = arith.constant 0 : i32
    %c0_i32_0 = arith.constant 0 : i32
    %c0_i32_1 = arith.constant 0 : i32
    return %c0_i32, %c0_i32_0 : i32, i32
  }
  func.func @transform_4(%arg0: i32) -> (i32, i32) {
    %c0_i32 = arith.constant 0 : i32
    %c0_i32_0 = arith.constant 0 : i32
    %c0_i32_1 = arith.constant 0 : i32
    return %c0_i32, %c0_i32_0 : i32, i32
  }
  func.func @transform_5(%arg0: i32) -> (i32, i32) {
    %c0_i32 = arith.constant 0 : i32
    %c0_i32_0 = arith.constant 0 : i32
    %c0_i32_1 = arith.constant 0 : i32
    return %c0_i32, %c0_i32_0 : i32, i32
  }
  func.func @transform_6(%arg0: i32) -> (i32, i32) {
    %c0_i32 = arith.constant 0 : i32
    %c0_i32_0 = arith.constant 0 : i32
    %c0_i32_1 = arith.constant 0 : i32
    return %c0_i32, %c0_i32_0 : i32, i32
  }
  func.func @transform_7(%arg0: i32) -> (i32, i32) {
    %c0_i32 = arith.constant 0 : i32
    %c0_i32_0 = arith.constant 0 : i32
    return %arg0, %c0_i32 : i32, i32
  }
}

</mosaic_0001>

<bundles_post_ra>
// kernel: tpu_custom_call.1
= control target key start
LH: loop header
LB: loop body
LE: loop exit
PB: predicated region body
PF: predicated region fallthrough
CT: control target
= control target key end

     0   :  { %12 = vsyncpa [#allocation3], 0  ;;  %s686_s0 = inlined_call_operand.vmem [shape: bf16[16,9], index: 0, kind: input, shape index: {}]   ;;  %s687_s1 = inlined_call_operand.hbm [shape: bf16[9,128], index: 1, kind: input, shape index: {}]   ;;  %s688_s2 = inlined_call_operand.vmem [shape: bf16[128,128], index: 2, kind: input, shape index: {}]   ;;  %s689_s3 = inlined_call_operand.vmem [shape: bf16[128,9], index: 3, kind: input, shape index: {}]   ;;  %s690_s4 = inlined_call_operand.vmem [shape: f32[1,128], index: 4, kind: input, shape index: {}]   ;;  %s691_s5 = inlined_call_operand.vmem [shape: f32[1,128], index: 5, kind: input, shape index: {}]   ;;  %s692_s6 = inlined_call_operand.vmem [shape: f32[1,9], index: 6, kind: input, shape index: {}]   ;;  %s693_s7 = inlined_call_operand.hbm [shape: f32[16,9], index: 7, kind: output, shape index: {}]  }
   0x1   :  { %13 = vsyncpa [#allocation4], 0  ;;  %s527_s24 = smov [#allocation2]   ;;  %s479_s28 = scalar_lea.hbm %s687_s1, 128 }
   0x2   :  { %s21_s25 = sshll.u32 %s527_s24, 4  ;;  %p480_p0 = scmp.ne.s32.totalorder %s687_s1, %s479_s28  ;;  %s22_s25 = int_to_ptr.vmem [resolvable:$true] %s21_s25 }
   0x3   :  { %p483_p1 = scmp.lt.u32.totalorder %s479_s28, %s687_s1 }
   0x5   :  { %p485_p2 = pnand %p483_p1, %p480_p0 }
   0x7   :  { %488 = shalt.err (!%p485_p2)
}
   0x8   :  { %s489_s10 = scalar_lea.vmem %s22_s25, 128  ;;  %p494_p4 = scmp.lt.s32.totalorder %s22_s25, %s22_s25 }
   0x9   :  { %p490_p3 = scmp.ne.s32.totalorder %s22_s25, %s489_s10  ;;  %p495_p5 = scmp.lt.s32.totalorder %s489_s10, %s489_s10 }
   0xb   :  { %p496_p6 = por %p495_p5, %p494_p4 }
   0xd   :  { %p497_p7 = pnand %p496_p6, %p490_p3 }
   0xf   :  { %500 = shalt.err (!%p497_p7)
}
  0x10   :  { %s528_s11 = smov 64   ;;  %s529_s12 = smov 4  }
  0x11   :  { %27 = dma.hbm_to_vmem [thread:$0]  %s687_s1, 128, %s22_s25, [#allocation3], %s528_s11, %s528_s11, %s529_s12  }
  0x12   :  { %523 = dma.done.wait [#allocation3], 128  }
  0x13   :  { %524 = vsyncadd [#allocation3], 4294967168  ;;  %vm67_vm0 = vcmask 1043456   ;;  %v530_v0 = vmov 0.0   ;;  %vm531_vm1 = vmmov 0   ;;  %vm68_vm2 = vcmask 1044480  }
  0x14   :  { %406 = vmatprep.subr.bf16.mxu0 %v530_v0  ;;  %412 = vmatprep.subr.bf16.mxu1 %v530_v0  ;;  %v532_v1 = vmov 65535   ;;  %v461_v4 = vld [vmem:[#allocation2] sm:$0x1f]   ;;  %vm63_vm3 = vcmask 72704   ;;  %v464_v8 = vld [vmem:[%s688_s2 + $0x8] sm:$0xff]   ;;  %v465_v9 = vld [vmem:[%s688_s2 + $0x10] sm:$0xff]  }
  0x15   :  { %408 = vmatprep.mubr.msk.bf16.mxu0 %vm531_vm1, %v530_v0  ;;  %428 = vmatprep.mubr.msk.bf16.mxu1 %vm531_vm1, %v530_v0  ;;  %v69_v2 = vsel %vm67_vm0, 4294967295, %v532_v1  ;;  %v463_v6 = vld [vmem:[%s688_s2] sm:$0xff]   ;;  %v466_v10 = vld [vmem:[%s688_s2 + $0x18] sm:$0xff]   ;;  %v468_v12 = vld [vmem:[%s688_s2 + $0x28] sm:$0xff]  }
  0x16   :  { %v70_v3 = vsel %vm68_vm2, %v69_v2, 0  ;;  %v462_v7 = vld [vmem:[%s686_s0] sm:$0xff]   ;;  %413 = vmatpush3.bf16.msra.mxu1 %v463_v6  ;;  %v469_v13 = vld [vmem:[%s688_s2 + $0x30] sm:$0xff]   ;;  %v470_v14 = vld [vmem:[%s688_s2 + $0x38] sm:$0xff]  }
  0x17   :  { %v72_v5 = vand.u32 %v461_v4, %v70_v3  ;;  %414 = vmatprep.subr.bf16.mxu1 %v530_v0  ;;  %v467_v11 = vld [vmem:[%s688_s2 + $0x20] sm:$0xff]   ;;  %v472_v16 = vld [vmem:[%s689_s3 + $0x8] sm:$0xff]   ;;  %v473_v17 = vld [vmem:[%s689_s3 + $0x10] sm:$0xff]  }
  0x18   :  { %v471_v15 = vld [vmem:[%s689_s3] sm:$0xff]   ;;  %v474_v18 = vld [vmem:[%s689_s3 + $0x18] sm:$0xff]   ;;  %v476_v20 = vld [vmem:[%s689_s3 + $0x28] sm:$0xff]  }
  0x19   :  { %407 = vmatpush3.bf16.msra.mxu0 %v72_v5  ;;  %v475_v19 = vld [vmem:[%s689_s3 + $0x20] sm:$0xff]   ;;  %v477_v31 = vld [vmem:[%s689_s3 + $0x30] sm:$0xff]   ;;  %v478_v32 = vld [vmem:[%s689_s3 + $0x38] sm:$0xff]   ;;  %s533_s3 = smov [#allocation5]  }
  0x1a   :  { %432 = vmatprep.subr.bf16.mxu0 %v530_v0  ;;  %415 = vmatpush3.bf16.msra.mxu1 %v464_v8  ;;  %v364_v21 = vld [vmem:[%s690_s4] ss:$0 sm:$0xff]  ;;  %s352_s26 = sshll.u32 %s533_s3, 4  ;;  %s353_s26 = int_to_ptr.vmem [resolvable:$true] %s352_s26 }
  0x1b   :  { %416 = vmatprep.subr.bf16.mxu1 %v530_v0  ;;  %v368_v33 = vld [vmem:[%s691_s5] ss:$0 sm:$0xff]  ;;  %s501_s5 = scalar_lea.vmem %s353_s26, 256  ;;  %p506_p9 = scmp.lt.s32.totalorder %s353_s26, %s353_s26 }
  0x1c   :  { %409 = vmatmul.mubr.msk.bf16.vlgmr.msra.gmra.mrb[0].mxu0 %vm63_vm3, %v462_v7  ;;  %v377_v43 = vld [vmem:[%s692_s6] ss:$0 sm:$0xff]  ;;  %p502_p8 = scmp.ne.s32.totalorder %s353_s26, %s501_s5  ;;  %p507_p10 = scmp.lt.s32.totalorder %s501_s5, %s501_s5 }
  0x1d   :  { %448 = vmatprep.mubr.msk.bf16.mxu0 %vm531_vm1, %v530_v0  ;;  %433 = vmatpush3.bf16.msra.mxu0 %v471_v15 }
  0x1e   :  { %417 = vmatpush3.bf16.msra.mxu1 %v465_v9  ;;  %434 = vmatprep.subr.bf16.mxu0 %v530_v0  ;;  %p508_p11 = por %p507_p10, %p506_p9 }
  0x1f   :  { %418 = vmatprep.subr.bf16.mxu1 %v530_v0 }
  0x20   :  { %p509_p12 = pnand %p508_p11, %p502_p8 }
  0x21   :  { %435 = vmatpush3.bf16.msra.mxu0 %v472_v16 }
  0x22   :  { %419 = vmatpush3.bf16.msra.mxu1 %v466_v10  ;;  %436 = vmatprep.subr.bf16.mxu0 %v530_v0 }
  0x23   :  { %420 = vmatprep.subr.bf16.mxu1 %v530_v0 }
  0x25   :  { %437 = vmatpush3.bf16.msra.mxu0 %v473_v17 }
  0x26   :  { %421 = vmatpush3.bf16.msra.mxu1 %v467_v11  ;;  %438 = vmatprep.subr.bf16.mxu0 %v530_v0 }
  0x27   :  { %422 = vmatprep.subr.bf16.mxu1 %v530_v0 }
  0x29   :  { %439 = vmatpush3.bf16.msra.mxu0 %v474_v18 }
  0x2a   :  { %423 = vmatpush3.bf16.msra.mxu1 %v468_v12  ;;  %440 = vmatprep.subr.bf16.mxu0 %v530_v0 }
  0x2b   :  { %424 = vmatprep.subr.bf16.mxu1 %v530_v0 }
  0x2d   :  { %441 = vmatpush3.bf16.msra.mxu0 %v475_v19 }
  0x2e   :  { %425 = vmatpush3.bf16.msra.mxu1 %v469_v13  ;;  %442 = vmatprep.subr.bf16.mxu0 %v530_v0 }
  0x2f   :  { %426 = vmatprep.subr.bf16.mxu1 %v530_v0 }
  0x31   :  { %443 = vmatpush3.bf16.msra.mxu0 %v476_v20 }
  0x32   :  { %427 = vmatpush3.bf16.msra.mxu1 %v470_v14  ;;  %444 = vmatprep.subr.bf16.mxu0 %v530_v0 }
  0x35   :  { %445 = vmatpush3.bf16.msra.mxu0 %v477_v31 }
  0x36   :  { %446 = vmatprep.subr.bf16.mxu0 %v530_v0 }
  0x39   :  { %447 = vmatpush3.bf16.msra.mxu0 %v478_v32 }
  0xef   :  { %v108_v22 = vpop.f32.mrb[0].mxu0 }
  0xf0   :  { %v109_v23 = vadd.f32 %v364_v21, %v108_v22  ;;  %v410_v24 = vpop.f32.mrb[1].mxu0 }
  0xf1   :  { %v111_v25 = vpop.f32.mrb[2].mxu0 }
  0xf2   :  { %v112_v26 = vadd.f32 %v364_v21, %v111_v25  ;;  %v411_v27 = vpop.f32.mrb[3].mxu0  ;;  %v115_v28 = vmax.f32 %v109_v23, 0.0 }
  0xf4   :  { %v116_v29 = vmax.f32 %v112_v26, 0.0 }
  0xf6   :  { %v117_v30 = vpack.c.bf16 %v116_v29, %v115_v28 }
  0xf8   :  { %429 = vmatmul.mubr.bf16.vlgmr.msra.gmra.mrb[0].mxu1 %v117_v30 }
 0x1cb   :  { %v223_v34 = vpop.f32.mrb[0].mxu1 }
 0x1cc   :  { %v224_v35 = vadd.f32 %v368_v33, %v223_v34  ;;  %v430_v36 = vpop.f32.mrb[1].mxu1 }
 0x1cd   :  { %v226_v37 = vpop.f32.mrb[2].mxu1 }
 0x1ce   :  { %v227_v38 = vadd.f32 %v368_v33, %v226_v37  ;;  %v431_v39 = vpop.f32.mrb[3].mxu1  ;;  %v230_v40 = vmax.f32 %v224_v35, 0.0 }
 0x1d0   :  { %v231_v41 = vmax.f32 %v227_v38, 0.0 }
 0x1d2   :  { %v232_v42 = vpack.c.bf16 %v231_v41, %v230_v40 }
 0x1d4   :  { %449 = vmatmul.mubr.bf16.vlgmr.msra.gmra.mrb[4].mxu0 %v232_v42 }
 0x2a7   :  { %v338_v44 = vpop.f32.mrb[4].mxu0 }
 0x2a8   :  { %v339_v45 = vadd.f32 %v377_v43, %v338_v44  ;;  %v450_v46 = vpop.f32.mrb[5].mxu0 }
 0x2a9   :  { %v341_v47 = vpop.f32.mrb[6].mxu0 }
 0x2aa   :  { %345 = vst.msk [vmem:[#allocation5] sm:$0xff] %vm63_vm3, %v339_v45  ;;  %v342_v48 = vadd.f32 %v377_v43, %v341_v47  ;;  %v451_v49 = vpop.f32.mrb[7].mxu0 }
 0x2ac   :  { %346 = vst.msk [vmem:[#allocation5 + $0x8] sm:$0xff] %vm63_vm3, %v342_v48 }
 0x2ad   :  { %512 = shalt.err (!%p509_p12)
}
 0x2ae   :  { %s513_s28 = scalar_lea.hbm %s693_s7, 256 }
 0x2af   :  { %p514_p13 = scmp.ne.s32.totalorder %s693_s7, %s513_s28  ;;  %p517_p0 = scmp.lt.u32.totalorder %s513_s28, %s693_s7 }
 0x2b1   :  { %p519_p1 = pnand %p517_p0, %p514_p13 }
 0x2b3   :  { %522 = shalt.err (!%p519_p1)
}
 0x2b4   :  { %s534_s10 = smov 128   ;;  %s535_s11 = smov 8  }
 0x2b5   :  { %358 = dma.vmem_to_hbm [thread:$0]  %s353_s26, 256, %s693_s7, [#allocation4], %s534_s10, %s534_s10, %s535_s11  }
 0x2b6   :  { %525 = dma.done.wait [#allocation4], 256  }
 0x2b7   :  { %526 = vsyncadd [#allocation4], 4294967040 }
 0x2b8   :  { %362 = vsyncpa [#allocation3], 1 }
 0x2b9   :  { %363 = vsyncpa [#allocation4], 1 }

</bundles_post_ra>
